<compile_context>
chip_gen: v7x
topology: tpu7x:2x2x1
jax: 0.10.0
libtpu: 0.0.40
codegen_flags: <defaults>
</compile_context>

<pallas_src>
import functools

import jax
import jax.numpy as jnp
from jax import lax
from jax.experimental import pallas as pl
from jax.experimental.pallas import tpu as pltpu


def _fused_kernel(params_ref, sti_ref, gl_ref, mv_ref, out_ref, *,
                  batch, num_vol, matmul_dtype):
    B = batch
    scale = params_ref[0]
    contrast_w = params_ref[1]
    near_w = params_ref[2]
    kl_w = params_ref[3]
    inv_b = 1.0 / B

    # ------------------------- contrastive part ---------------------------
    sti = sti_ref[...].astype(jnp.float32)                       # (3B, D) = [shape; text; image]
    sumsq = jnp.sum(sti * sti, axis=-1, keepdims=True)
    # matches F.normalize(p=2, dim=-1, eps=1e-12): x / max(||x||, 1e-12)
    sti_n = sti * lax.rsqrt(jnp.maximum(sumsq, 1e-24))

    s_n = sti_n[:B]                                              # (B, D)
    t_n = sti_n[B:2 * B]                                         # (B, D)
    i_n = sti_n[2 * B:]                                          # (B, D)

    # diagonals of the logit matrices as row-wise dots (no eye mask)
    diag_st = scale * jnp.sum(s_n * t_n, axis=-1, keepdims=True)  # (B, 1)
    diag_si = scale * jnp.sum(s_n * i_n, axis=-1, keepdims=True)  # (B, 1)

    # one MXU slab: (B, 2B) = [shape@text.T | shape@image.T]
    lhs = s_n.astype(matmul_dtype)
    rhs = sti_n[B:].astype(matmul_dtype)                          # (2B, D)
    logits = scale * lax.dot_general(
        lhs, rhs, (((1,), (1,)), ((), ())),
        preferred_element_type=jnp.float32)                       # (B, 2B)

    def ce_sym(lg, diag):
        # cross entropy with labels = arange(B) for lg AND lg.T, plus row acc.
        gmax = jnp.max(lg)                                        # scalar
        p = jnp.exp(lg - gmax)                                    # single exp pass, exponents <= 0
        lse_r = gmax + jnp.log(jnp.sum(p, axis=-1, keepdims=True))
        lse_c = gmax + jnp.log(jnp.sum(p, axis=0, keepdims=True))
        sum_diag = jnp.sum(diag)                                  # trace(lg): shared by both dirs
        ce_fwd = (jnp.sum(lse_r) - sum_diag) * inv_b
        ce_bwd = (jnp.sum(lse_c) - sum_diag) * inv_b
        # argmax == label  <=>  diag element is the row max (ties / exact
        # rounding coincidences are measure-~0 for f32 random embeddings).
        mr = jnp.max(lg, axis=-1, keepdims=True)
        acc = 100.0 * jnp.sum((diag >= mr).astype(jnp.float32)) * inv_b
        return ce_fwd, ce_bwd, acc

    ce_st, ce_ts, st_acc = ce_sym(logits[:, :B], diag_st)
    ce_si, ce_is, si_acc = ce_sym(logits[:, B:], diag_si)
    # exactly the torch expression: (CE(st)+CE(ts))/2 + (CE(si)+CE(is))/2
    contrast_loss = (ce_st + ce_ts) * 0.5 + (ce_si + ce_is) * 0.5

    # --------------------------- occupancy BCE ----------------------------
    gl = gl_ref[...].astype(jnp.float32)                          # (2B, N) = [logits; labels]
    x = gl[:B]
    y = gl[B:]
    n_samples = x.shape[1]
    # numerically-stable BCEWithLogits: max(x,0) - x*y + log(1 + exp(-|x|))
    elem = jnp.maximum(x, 0.0) - x * y + jnp.log(1.0 + jnp.exp(-jnp.abs(x)))
    col = lax.broadcasted_iota(jnp.int32, (B, n_samples), 1)
    vol_sum = jnp.sum(jnp.where(col < num_vol, elem, 0.0))
    tot_sum = jnp.sum(elem)
    vol_bce = vol_sum / (B * num_vol)
    near_bce = (tot_sum - vol_sum) / (B * (n_samples - num_vol))
    preds = (x >= 0.0).astype(jnp.float32)
    bce_acc = jnp.mean((preds == y).astype(jnp.float32))

    # ------------------------ KL + posterior stats ------------------------
    mv = mv_ref[...].astype(jnp.float32)                          # (2B, T*C) = [mean; logvar]
    mean = mv[:B]
    logvar = jnp.clip(mv[B:], -30.0, 20.0)
    std = jnp.exp(0.5 * logvar)                                   # single exp pass
    var = std * std
    # posteriors.kl(dims=(1,2)) then mean over batch
    kl_loss = 0.5 * jnp.sum(mean * mean + var - 1.0 - logvar) * inv_b
    post_mean_mean = jnp.mean(mean)
    std_mean = jnp.mean(std)
    std_max = jnp.max(std)

    total = (vol_bce + near_bce * near_w + kl_loss * kl_w
             + contrast_loss * contrast_w)

    out_ref[0] = contrast_loss
    out_ref[1] = st_acc
    out_ref[2] = si_acc
    out_ref[3] = vol_bce
    out_ref[4] = near_bce
    out_ref[5] = bce_acc
    out_ref[6] = kl_loss
    out_ref[7] = total
    out_ref[8] = post_mean_mean
    out_ref[9] = std_mean
    out_ref[10] = std_max


def contrast_kl_near_far(shape_embed, text_embed, image_embed, logit_scale,
                         post_mean, post_logvar, shape_logits, shape_labels,
                         contrast_weight=1.0, near_weight=0.1, kl_weight=1.0,
                         num_near_samples=None, split="train",
                         use_bf16_matmul=False):
    B = shape_embed.shape[0]
    n_samples = shape_logits.shape[1]
    if num_near_samples is None:
        num_vol = n_samples // 2
    else:
        num_vol = n_samples - num_near_samples

    # pack inputs -> 4 DMA transfers into the kernel
    sti = jnp.concatenate([shape_embed, text_embed, image_embed],
                          axis=0).astype(jnp.float32)             # (3B, D)
    gl = jnp.concatenate([shape_logits, shape_labels],
                         axis=0).astype(jnp.float32)              # (2B, N)
    mv = jnp.concatenate([post_mean.reshape(B, -1),
                          post_logvar.reshape(B, -1)],
                         axis=0).astype(jnp.float32)              # (2B, T*C)

    params = jnp.stack([
        jnp.asarray(logit_scale, jnp.float32).reshape(()),
        jnp.asarray(contrast_weight, jnp.float32),
        jnp.asarray(near_weight, jnp.float32),
        jnp.asarray(kl_weight, jnp.float32),
    ])

    kernel = functools.partial(
        _fused_kernel, batch=B, num_vol=num_vol,
        matmul_dtype=jnp.bfloat16 if use_bf16_matmul else jnp.float32)

    smem = pl.BlockSpec(memory_space=pltpu.MemorySpace.SMEM)
    vmem = pl.BlockSpec(memory_space=pltpu.MemorySpace.VMEM)

    out = pl.pallas_call(
        kernel,
        out_shape=jax.ShapeDtypeStruct((11,), jnp.float32),
        in_specs=[smem, vmem, vmem, vmem],
        out_specs=smem,
    )(params, sti, gl, mv)

    contrast_loss = out[0]
    st_acc = out[1]
    si_acc = out[2]
    vol_bce = out[3]
    near_bce = out[4]
    accuracy = out[5]
    kl_loss = out[6]
    loss = out[7]

    log = {
        f"{split}/contrast": contrast_loss,
        f"{split}/near": near_bce,
        f"{split}/far": vol_bce,
        f"{split}/kl": kl_loss,
        f"{split}/shape_text_acc": st_acc,
        f"{split}/shape_image_acc": si_acc,
        f"{split}/total_loss": loss,
        f"{split}/accuracy": accuracy,
        f"{split}/mean": out[8],
        f"{split}/std_mean": out[9],
        f"{split}/std_max": out[10],
    }
    return loss, log


if __name__ == "__main__":
    key = jax.random.PRNGKey(0)
    ks = jax.random.split(key, 7)

    B, D = 8, 32       # batch, embedding dim
    N = 16             # occupancy samples per shape (num_vol = N // 2)
    T, C = 8, 32       # posterior latent tokens x channels

    shape_embed = jax.random.normal(ks[0], (B, D), jnp.float32)
    text_embed = jax.random.normal(ks[1], (B, D), jnp.float32)
    image_embed = jax.random.normal(ks[2], (B, D), jnp.float32)
    logit_scale = jnp.float32(14.285714)  # ~ 1/0.07

    shape_logits = jax.random.normal(ks[3], (B, N), jnp.float32)
    shape_labels = (jax.random.uniform(ks[4], (B, N)) > 0.5).astype(jnp.float32)

    post_mean = 0.5 * jax.random.normal(ks[5], (B, T, C), jnp.float32)
    post_logvar = 0.1 * jax.random.normal(ks[6], (B, T, C), jnp.float32)

    loss, log = contrast_kl_near_far(
        shape_embed, text_embed, image_embed, logit_scale,
        post_mean, post_logvar, shape_logits, shape_labels)

    jax.block_until_ready(loss)
    jax.block_until_ready(log)
    print("KERNEL_OK")
</pallas_src>

<mosaic_0001>
module attributes {stable_mosaic.version = 11 : i64} {
  func.func @_fused_kernel(%arg0: memref<4xf32, #tpu.memory_space<smem>>, %arg1: memref<24x32xf32, #tpu.memory_space<vmem>>, %arg2: memref<16x16xf32, #tpu.memory_space<vmem>>, %arg3: memref<16x256xf32, #tpu.memory_space<vmem>>, %arg4: memref<11xf32, #tpu.memory_space<smem>>) attributes {dimension_semantics = [], scalar_prefetch = 0 : i64, scratch_operands = 0 : i64, tpu.core_type = #tpu.core_type<tc>} {
    %c0 = arith.constant 0 : index
    %0 = memref.load %arg0[%c0] : memref<4xf32, #tpu.memory_space<smem>>
    %c1 = arith.constant 1 : index
    %1 = memref.load %arg0[%c1] : memref<4xf32, #tpu.memory_space<smem>>
    %c2 = arith.constant 2 : index
    %2 = memref.load %arg0[%c2] : memref<4xf32, #tpu.memory_space<smem>>
    %c3 = arith.constant 3 : index
    %3 = memref.load %arg0[%c3] : memref<4xf32, #tpu.memory_space<smem>>
    %c0_0 = arith.constant 0 : index
    %c0_1 = arith.constant 0 : index
    %4 = vector.load %arg1[%c0_0, %c0_1] : memref<24x32xf32, #tpu.memory_space<vmem>>, vector<24x32xf32>
    %5 = arith.mulf %4, %4 : vector<24x32xf32>
    %cst = arith.constant dense<0.000000e+00> : vector<24xf32>
    %6 = vector.multi_reduction <add>, %5, %cst [1] : vector<24x32xf32> to vector<24xf32>
    %7 = vector.shape_cast %6 : vector<24xf32> to vector<24x1xf32>
    %cst_2 = arith.constant 1.000000e-24 : f32
    %8 = vector.broadcast %cst_2 : f32 to vector<24x1xf32>
    %9 = arith.maximumf %7, %8 : vector<24x1xf32>
    %10 = math.rsqrt %9 : vector<24x1xf32>
    %11 = vector.broadcast %10 : vector<24x1xf32> to vector<24x32xf32>
    %12 = arith.mulf %4, %11 : vector<24x32xf32>
    %13 = vector.extract_strided_slice %12 {offsets = [0, 0], sizes = [8, 32], strides = [1, 1]} : vector<24x32xf32> to vector<8x32xf32>
    %14 = vector.extract_strided_slice %12 {offsets = [8, 0], sizes = [8, 32], strides = [1, 1]} : vector<24x32xf32> to vector<8x32xf32>
    %15 = vector.extract_strided_slice %12 {offsets = [16, 0], sizes = [8, 32], strides = [1, 1]} : vector<24x32xf32> to vector<8x32xf32>
    %16 = arith.mulf %13, %14 : vector<8x32xf32>
    %cst_3 = arith.constant dense<0.000000e+00> : vector<8xf32>
    %17 = vector.multi_reduction <add>, %16, %cst_3 [1] : vector<8x32xf32> to vector<8xf32>
    %18 = vector.shape_cast %17 : vector<8xf32> to vector<8x1xf32>
    %19 = vector.broadcast %0 : f32 to vector<8x1xf32>
    %20 = arith.mulf %19, %18 : vector<8x1xf32>
    %21 = arith.mulf %13, %15 : vector<8x32xf32>
    %cst_4 = arith.constant dense<0.000000e+00> : vector<8xf32>
    %22 = vector.multi_reduction <add>, %21, %cst_4 [1] : vector<8x32xf32> to vector<8xf32>
    %23 = vector.shape_cast %22 : vector<8xf32> to vector<8x1xf32>
    %24 = vector.broadcast %0 : f32 to vector<8x1xf32>
    %25 = arith.mulf %24, %23 : vector<8x1xf32>
    %26 = vector.extract_strided_slice %12 {offsets = [8, 0], sizes = [16, 32], strides = [1, 1]} : vector<24x32xf32> to vector<16x32xf32>
    %cst_5 = arith.constant dense<0.000000e+00> : vector<8x16xf32>
    %27 = tpu.matmul %13, %26, %cst_5 {dimension_numbers = #tpu.dot_dimension_numbers<[1], [1], [0], [0], [0, 0, 1, 0], [], []>} : vector<8x32xf32>, vector<16x32xf32>, vector<8x16xf32> -> vector<8x16xf32>
    %28 = vector.broadcast %0 : f32 to vector<8x16xf32>
    %29 = arith.mulf %28, %27 : vector<8x16xf32>
    %30 = vector.extract_strided_slice %29 {offsets = [0, 0], sizes = [8, 8], strides = [1, 1]} : vector<8x16xf32> to vector<8x8xf32>
    %31 = vector.shape_cast %30 : vector<8x8xf32> to vector<1x8x8xf32>
    %cst_6 = arith.constant dense<0xFF800000> : vector<1xf32>
    %32 = vector.multi_reduction <maximumf>, %31, %cst_6 [1, 2] : vector<1x8x8xf32> to vector<1xf32>
    %33 = vector.shape_cast %32 : vector<1xf32> to vector<1x1x1xf32>
    %34 = vector.extract %33[0, 0, 0] : f32 from vector<1x1x1xf32>
    %35 = vector.broadcast %34 : f32 to vector<8x8xf32>
    %36 = arith.subf %30, %35 : vector<8x8xf32>
    %37 = math.exp %36 : vector<8x8xf32>
    %cst_7 = arith.constant dense<0.000000e+00> : vector<8xf32>
    %38 = vector.multi_reduction <add>, %37, %cst_7 [1] : vector<8x8xf32> to vector<8xf32>
    %39 = vector.shape_cast %38 : vector<8xf32> to vector<8x1xf32>
    %40 = math.log %39 : vector<8x1xf32>
    %41 = vector.broadcast %34 : f32 to vector<8x1xf32>
    %42 = arith.addf %41, %40 : vector<8x1xf32>
    %cst_8 = arith.constant dense<0.000000e+00> : vector<8xf32>
    %43 = vector.multi_reduction <add>, %37, %cst_8 [0] : vector<8x8xf32> to vector<8xf32>
    %44 = vector.shape_cast %43 : vector<8xf32> to vector<1x8xf32>
    %45 = math.log %44 : vector<1x8xf32>
    %46 = vector.broadcast %34 : f32 to vector<1x8xf32>
    %47 = arith.addf %46, %45 : vector<1x8xf32>
    %48 = vector.shape_cast %20 : vector<8x1xf32> to vector<1x8x1xf32>
    %cst_9 = arith.constant dense<0.000000e+00> : vector<1xf32>
    %49 = vector.multi_reduction <add>, %48, %cst_9 [1, 2] : vector<1x8x1xf32> to vector<1xf32>
    %50 = vector.shape_cast %49 : vector<1xf32> to vector<1x1x1xf32>
    %51 = vector.extract %50[0, 0, 0] : f32 from vector<1x1x1xf32>
    %52 = vector.shape_cast %42 : vector<8x1xf32> to vector<1x8x1xf32>
    %cst_10 = arith.constant dense<0.000000e+00> : vector<1xf32>
    %53 = vector.multi_reduction <add>, %52, %cst_10 [1, 2] : vector<1x8x1xf32> to vector<1xf32>
    %54 = vector.shape_cast %53 : vector<1xf32> to vector<1x1x1xf32>
    %55 = vector.extract %54[0, 0, 0] : f32 from vector<1x1x1xf32>
    %56 = arith.subf %55, %51 : f32
    %cst_11 = arith.constant 1.250000e-01 : f32
    %57 = arith.mulf %56, %cst_11 : f32
    %58 = vector.shape_cast %47 : vector<1x8xf32> to vector<1x1x8xf32>
    %cst_12 = arith.constant dense<0.000000e+00> : vector<1xf32>
    %59 = vector.multi_reduction <add>, %58, %cst_12 [1, 2] : vector<1x1x8xf32> to vector<1xf32>
    %60 = vector.shape_cast %59 : vector<1xf32> to vector<1x1x1xf32>
    %61 = vector.extract %60[0, 0, 0] : f32 from vector<1x1x1xf32>
    %62 = arith.subf %61, %51 : f32
    %cst_13 = arith.constant 1.250000e-01 : f32
    %63 = arith.mulf %62, %cst_13 : f32
    %cst_14 = arith.constant dense<0xFF800000> : vector<8xf32>
    %64 = vector.multi_reduction <maximumf>, %30, %cst_14 [1] : vector<8x8xf32> to vector<8xf32>
    %65 = vector.shape_cast %64 : vector<8xf32> to vector<8x1xf32>
    %66 = arith.cmpf oge, %20, %65 : vector<8x1xf32>
    %67 = arith.extui %66 : vector<8x1xi1> to vector<8x1xi32>
    %68 = arith.sitofp %67 : vector<8x1xi32> to vector<8x1xf32>
    %69 = vector.shape_cast %68 : vector<8x1xf32> to vector<1x8x1xf32>
    %cst_15 = arith.constant dense<0.000000e+00> : vector<1xf32>
    %70 = vector.multi_reduction <add>, %69, %cst_15 [1, 2] : vector<1x8x1xf32> to vector<1xf32>
    %71 = vector.shape_cast %70 : vector<1xf32> to vector<1x1x1xf32>
    %72 = vector.extract %71[0, 0, 0] : f32 from vector<1x1x1xf32>
    %cst_16 = arith.constant 1.000000e+02 : f32
    %73 = arith.mulf %cst_16, %72 : f32
    %cst_17 = arith.constant 1.250000e-01 : f32
    %74 = arith.mulf %73, %cst_17 : f32
    %75 = vector.extract_strided_slice %29 {offsets = [0, 8], sizes = [8, 8], strides = [1, 1]} : vector<8x16xf32> to vector<8x8xf32>
    %76 = vector.shape_cast %75 : vector<8x8xf32> to vector<1x8x8xf32>
    %cst_18 = arith.constant dense<0xFF800000> : vector<1xf32>
    %77 = vector.multi_reduction <maximumf>, %76, %cst_18 [1, 2] : vector<1x8x8xf32> to vector<1xf32>
    %78 = vector.shape_cast %77 : vector<1xf32> to vector<1x1x1xf32>
    %79 = vector.extract %78[0, 0, 0] : f32 from vector<1x1x1xf32>
    %80 = vector.broadcast %79 : f32 to vector<8x8xf32>
    %81 = arith.subf %75, %80 : vector<8x8xf32>
    %82 = math.exp %81 : vector<8x8xf32>
    %cst_19 = arith.constant dense<0.000000e+00> : vector<8xf32>
    %83 = vector.multi_reduction <add>, %82, %cst_19 [1] : vector<8x8xf32> to vector<8xf32>
    %84 = vector.shape_cast %83 : vector<8xf32> to vector<8x1xf32>
    %85 = math.log %84 : vector<8x1xf32>
    %86 = vector.broadcast %79 : f32 to vector<8x1xf32>
    %87 = arith.addf %86, %85 : vector<8x1xf32>
    %cst_20 = arith.constant dense<0.000000e+00> : vector<8xf32>
    %88 = vector.multi_reduction <add>, %82, %cst_20 [0] : vector<8x8xf32> to vector<8xf32>
    %89 = vector.shape_cast %88 : vector<8xf32> to vector<1x8xf32>
    %90 = math.log %89 : vector<1x8xf32>
    %91 = vector.broadcast %79 : f32 to vector<1x8xf32>
    %92 = arith.addf %91, %90 : vector<1x8xf32>
    %93 = vector.shape_cast %25 : vector<8x1xf32> to vector<1x8x1xf32>
    %cst_21 = arith.constant dense<0.000000e+00> : vector<1xf32>
    %94 = vector.multi_reduction <add>, %93, %cst_21 [1, 2] : vector<1x8x1xf32> to vector<1xf32>
    %95 = vector.shape_cast %94 : vector<1xf32> to vector<1x1x1xf32>
    %96 = vector.extract %95[0, 0, 0] : f32 from vector<1x1x1xf32>
    %97 = vector.shape_cast %87 : vector<8x1xf32> to vector<1x8x1xf32>
    %cst_22 = arith.constant dense<0.000000e+00> : vector<1xf32>
    %98 = vector.multi_reduction <add>, %97, %cst_22 [1, 2] : vector<1x8x1xf32> to vector<1xf32>
    %99 = vector.shape_cast %98 : vector<1xf32> to vector<1x1x1xf32>
    %100 = vector.extract %99[0, 0, 0] : f32 from vector<1x1x1xf32>
    %101 = arith.subf %100, %96 : f32
    %cst_23 = arith.constant 1.250000e-01 : f32
    %102 = arith.mulf %101, %cst_23 : f32
    %103 = vector.shape_cast %92 : vector<1x8xf32> to vector<1x1x8xf32>
    %cst_24 = arith.constant dense<0.000000e+00> : vector<1xf32>
    %104 = vector.multi_reduction <add>, %103, %cst_24 [1, 2] : vector<1x1x8xf32> to vector<1xf32>
    %105 = vector.shape_cast %104 : vector<1xf32> to vector<1x1x1xf32>
    %106 = vector.extract %105[0, 0, 0] : f32 from vector<1x1x1xf32>
    %107 = arith.subf %106, %96 : f32
    %cst_25 = arith.constant 1.250000e-01 : f32
    %108 = arith.mulf %107, %cst_25 : f32
    %cst_26 = arith.constant dense<0xFF800000> : vector<8xf32>
    %109 = vector.multi_reduction <maximumf>, %75, %cst_26 [1] : vector<8x8xf32> to vector<8xf32>
    %110 = vector.shape_cast %109 : vector<8xf32> to vector<8x1xf32>
    %111 = arith.cmpf oge, %25, %110 : vector<8x1xf32>
    %112 = arith.extui %111 : vector<8x1xi1> to vector<8x1xi32>
    %113 = arith.sitofp %112 : vector<8x1xi32> to vector<8x1xf32>
    %114 = vector.shape_cast %113 : vector<8x1xf32> to vector<1x8x1xf32>
    %cst_27 = arith.constant dense<0.000000e+00> : vector<1xf32>
    %115 = vector.multi_reduction <add>, %114, %cst_27 [1, 2] : vector<1x8x1xf32> to vector<1xf32>
    %116 = vector.shape_cast %115 : vector<1xf32> to vector<1x1x1xf32>
    %117 = vector.extract %116[0, 0, 0] : f32 from vector<1x1x1xf32>
    %cst_28 = arith.constant 1.000000e+02 : f32
    %118 = arith.mulf %cst_28, %117 : f32
    %cst_29 = arith.constant 1.250000e-01 : f32
    %119 = arith.mulf %118, %cst_29 : f32
    %120 = arith.addf %57, %63 : f32
    %cst_30 = arith.constant 5.000000e-01 : f32
    %121 = arith.mulf %120, %cst_30 : f32
    %122 = arith.addf %102, %108 : f32
    %cst_31 = arith.constant 5.000000e-01 : f32
    %123 = arith.mulf %122, %cst_31 : f32
    %124 = arith.addf %121, %123 : f32
    %c0_32 = arith.constant 0 : index
    %c0_33 = arith.constant 0 : index
    %125 = vector.load %arg2[%c0_32, %c0_33] : memref<16x16xf32, #tpu.memory_space<vmem>>, vector<16x16xf32>
    %126 = vector.extract_strided_slice %125 {offsets = [0, 0], sizes = [8, 16], strides = [1, 1]} : vector<16x16xf32> to vector<8x16xf32>
    %127 = vector.extract_strided_slice %125 {offsets = [8, 0], sizes = [8, 16], strides = [1, 1]} : vector<16x16xf32> to vector<8x16xf32>
    %cst_34 = arith.constant 0.000000e+00 : f32
    %128 = vector.broadcast %cst_34 : f32 to vector<8x16xf32>
    %129 = arith.maximumf %126, %128 : vector<8x16xf32>
    %130 = arith.mulf %126, %127 : vector<8x16xf32>
    %131 = arith.subf %129, %130 : vector<8x16xf32>
    %132 = math.absf %126 : vector<8x16xf32>
    %cst_35 = arith.constant 0.000000e+00 : f32
    %133 = vector.broadcast %cst_35 : f32 to vector<8x16xf32>
    %134 = arith.subf %133, %132 : vector<8x16xf32>
    %135 = math.exp %134 : vector<8x16xf32>
    %cst_36 = arith.constant 1.000000e+00 : f32
    %136 = vector.broadcast %cst_36 : f32 to vector<8x16xf32>
    %137 = arith.addf %136, %135 : vector<8x16xf32>
    %138 = math.log %137 : vector<8x16xf32>
    %139 = arith.addf %131, %138 : vector<8x16xf32>
    %140 = tpu.iota {dimensions = array<i32: 1>} : vector<8x16xi32>
    %c8_i32 = arith.constant 8 : i32
    %141 = vector.broadcast %c8_i32 : i32 to vector<8x16xi32>
    %142 = arith.cmpi slt, %140, %141 : vector<8x16xi32>
    %cst_37 = arith.constant 0.000000e+00 : f32
    %143 = vector.broadcast %cst_37 : f32 to vector<8x16xf32>
    %144 = arith.select %142, %139, %143 : vector<8x16xi1>, vector<8x16xf32>
    %145 = vector.shape_cast %144 : vector<8x16xf32> to vector<1x8x16xf32>
    %cst_38 = arith.constant dense<0.000000e+00> : vector<1xf32>
    %146 = vector.multi_reduction <add>, %145, %cst_38 [1, 2] : vector<1x8x16xf32> to vector<1xf32>
    %147 = vector.shape_cast %146 : vector<1xf32> to vector<1x1x1xf32>
    %148 = vector.extract %147[0, 0, 0] : f32 from vector<1x1x1xf32>
    %149 = vector.shape_cast %139 : vector<8x16xf32> to vector<1x8x16xf32>
    %cst_39 = arith.constant dense<0.000000e+00> : vector<1xf32>
    %150 = vector.multi_reduction <add>, %149, %cst_39 [1, 2] : vector<1x8x16xf32> to vector<1xf32>
    %151 = vector.shape_cast %150 : vector<1xf32> to vector<1x1x1xf32>
    %152 = vector.extract %151[0, 0, 0] : f32 from vector<1x1x1xf32>
    %cst_40 = arith.constant 6.400000e+01 : f32
    %153 = arith.divf %148, %cst_40 : f32
    %154 = arith.subf %152, %148 : f32
    %cst_41 = arith.constant 6.400000e+01 : f32
    %155 = arith.divf %154, %cst_41 : f32
    %cst_42 = arith.constant 0.000000e+00 : f32
    %156 = vector.broadcast %cst_42 : f32 to vector<8x16xf32>
    %157 = arith.cmpf oge, %126, %156 : vector<8x16xf32>
    %158 = arith.extui %157 : vector<8x16xi1> to vector<8x16xi32>
    %159 = arith.sitofp %158 : vector<8x16xi32> to vector<8x16xf32>
    %160 = arith.cmpf oeq, %159, %127 : vector<8x16xf32>
    %161 = arith.extui %160 : vector<8x16xi1> to vector<8x16xi32>
    %162 = arith.sitofp %161 : vector<8x16xi32> to vector<8x16xf32>
    %163 = vector.shape_cast %162 : vector<8x16xf32> to vector<1x8x16xf32>
    %cst_43 = arith.constant dense<0.000000e+00> : vector<1xf32>
    %164 = vector.multi_reduction <add>, %163, %cst_43 [1, 2] : vector<1x8x16xf32> to vector<1xf32>
    %165 = vector.shape_cast %164 : vector<1xf32> to vector<1x1x1xf32>
    %166 = vector.extract %165[0, 0, 0] : f32 from vector<1x1x1xf32>
    %cst_44 = arith.constant 1.280000e+02 : f32
    %167 = arith.divf %166, %cst_44 : f32
    %c0_45 = arith.constant 0 : index
    %c0_46 = arith.constant 0 : index
    %168 = vector.load %arg3[%c0_45, %c0_46] : memref<16x256xf32, #tpu.memory_space<vmem>>, vector<16x256xf32>
    %169 = vector.extract_strided_slice %168 {offsets = [0, 0], sizes = [8, 256], strides = [1, 1]} : vector<16x256xf32> to vector<8x256xf32>
    %170 = vector.extract_strided_slice %168 {offsets = [8, 0], sizes = [8, 256], strides = [1, 1]} : vector<16x256xf32> to vector<8x256xf32>
    %cst_47 = arith.constant -3.000000e+01 : f32
    %cst_48 = arith.constant 2.000000e+01 : f32
    %171 = vector.broadcast %cst_47 : f32 to vector<8x256xf32>
    %172 = arith.maximumf %171, %170 : vector<8x256xf32>
    %173 = vector.broadcast %cst_48 : f32 to vector<8x256xf32>
    %174 = arith.minimumf %173, %172 : vector<8x256xf32>
    %cst_49 = arith.constant 5.000000e-01 : f32
    %175 = vector.broadcast %cst_49 : f32 to vector<8x256xf32>
    %176 = arith.mulf %175, %174 : vector<8x256xf32>
    %177 = math.exp %176 : vector<8x256xf32>
    %178 = arith.mulf %177, %177 : vector<8x256xf32>
    %179 = arith.mulf %169, %169 : vector<8x256xf32>
    %180 = arith.addf %179, %178 : vector<8x256xf32>
    %cst_50 = arith.constant 1.000000e+00 : f32
    %181 = vector.broadcast %cst_50 : f32 to vector<8x256xf32>
    %182 = arith.subf %180, %181 : vector<8x256xf32>
    %183 = arith.subf %182, %174 : vector<8x256xf32>
    %184 = vector.shape_cast %183 : vector<8x256xf32> to vector<1x8x256xf32>
    %cst_51 = arith.constant dense<0.000000e+00> : vector<1xf32>
    %185 = vector.multi_reduction <add>, %184, %cst_51 [1, 2] : vector<1x8x256xf32> to vector<1xf32>
    %186 = vector.shape_cast %185 : vector<1xf32> to vector<1x1x1xf32>
    %187 = vector.extract %186[0, 0, 0] : f32 from vector<1x1x1xf32>
    %cst_52 = arith.constant 5.000000e-01 : f32
    %188 = arith.mulf %cst_52, %187 : f32
    %cst_53 = arith.constant 1.250000e-01 : f32
    %189 = arith.mulf %188, %cst_53 : f32
    %190 = vector.shape_cast %169 : vector<8x256xf32> to vector<1x8x256xf32>
    %cst_54 = arith.constant dense<0.000000e+00> : vector<1xf32>
    %191 = vector.multi_reduction <add>, %190, %cst_54 [1, 2] : vector<1x8x256xf32> to vector<1xf32>
    %192 = vector.shape_cast %191 : vector<1xf32> to vector<1x1x1xf32>
    %193 = vector.extract %192[0, 0, 0] : f32 from vector<1x1x1xf32>
    %cst_55 = arith.constant 2.048000e+03 : f32
    %194 = arith.divf %193, %cst_55 : f32
    %195 = vector.shape_cast %177 : vector<8x256xf32> to vector<1x8x256xf32>
    %cst_56 = arith.constant dense<0.000000e+00> : vector<1xf32>
    %196 = vector.multi_reduction <add>, %195, %cst_56 [1, 2] : vector<1x8x256xf32> to vector<1xf32>
    %197 = vector.shape_cast %196 : vector<1xf32> to vector<1x1x1xf32>
    %198 = vector.extract %197[0, 0, 0] : f32 from vector<1x1x1xf32>
    %cst_57 = arith.constant 2.048000e+03 : f32
    %199 = arith.divf %198, %cst_57 : f32
    %200 = vector.shape_cast %177 : vector<8x256xf32> to vector<1x8x256xf32>
    %cst_58 = arith.constant dense<0xFF800000> : vector<1xf32>
    %201 = vector.multi_reduction <maximumf>, %200, %cst_58 [1, 2] : vector<1x8x256xf32> to vector<1xf32>
    %202 = vector.shape_cast %201 : vector<1xf32> to vector<1x1x1xf32>
    %203 = vector.extract %202[0, 0, 0] : f32 from vector<1x1x1xf32>
    %204 = arith.mulf %155, %2 : f32
    %205 = arith.addf %153, %204 : f32
    %206 = arith.mulf %189, %3 : f32
    %207 = arith.addf %205, %206 : f32
    %208 = arith.mulf %124, %1 : f32
    %209 = arith.addf %207, %208 : f32
    %c0_59 = arith.constant 0 : index
    %210 = memref.load %arg4[%c0_59] : memref<11xf32, #tpu.memory_space<smem>>
    memref.store %124, %arg4[%c0_59] : memref<11xf32, #tpu.memory_space<smem>>
    %c1_60 = arith.constant 1 : index
    %211 = memref.load %arg4[%c1_60] : memref<11xf32, #tpu.memory_space<smem>>
    memref.store %74, %arg4[%c1_60] : memref<11xf32, #tpu.memory_space<smem>>
    %c2_61 = arith.constant 2 : index
    %212 = memref.load %arg4[%c2_61] : memref<11xf32, #tpu.memory_space<smem>>
    memref.store %119, %arg4[%c2_61] : memref<11xf32, #tpu.memory_space<smem>>
    %c3_62 = arith.constant 3 : index
    %213 = memref.load %arg4[%c3_62] : memref<11xf32, #tpu.memory_space<smem>>
    memref.store %153, %arg4[%c3_62] : memref<11xf32, #tpu.memory_space<smem>>
    %c4 = arith.constant 4 : index
    %214 = memref.load %arg4[%c4] : memref<11xf32, #tpu.memory_space<smem>>
    memref.store %155, %arg4[%c4] : memref<11xf32, #tpu.memory_space<smem>>
    %c5 = arith.constant 5 : index
    %215 = memref.load %arg4[%c5] : memref<11xf32, #tpu.memory_space<smem>>
    memref.store %167, %arg4[%c5] : memref<11xf32, #tpu.memory_space<smem>>
    %c6 = arith.constant 6 : index
    %216 = memref.load %arg4[%c6] : memref<11xf32, #tpu.memory_space<smem>>
    memref.store %189, %arg4[%c6] : memref<11xf32, #tpu.memory_space<smem>>
    %c7 = arith.constant 7 : index
    %217 = memref.load %arg4[%c7] : memref<11xf32, #tpu.memory_space<smem>>
    memref.store %209, %arg4[%c7] : memref<11xf32, #tpu.memory_space<smem>>
    %c8 = arith.constant 8 : index
    %218 = memref.load %arg4[%c8] : memref<11xf32, #tpu.memory_space<smem>>
    memref.store %194, %arg4[%c8] : memref<11xf32, #tpu.memory_space<smem>>
    %c9 = arith.constant 9 : index
    %219 = memref.load %arg4[%c9] : memref<11xf32, #tpu.memory_space<smem>>
    memref.store %199, %arg4[%c9] : memref<11xf32, #tpu.memory_space<smem>>
    %c10 = arith.constant 10 : index
    %220 = memref.load %arg4[%c10] : memref<11xf32, #tpu.memory_space<smem>>
    memref.store %203, %arg4[%c10] : memref<11xf32, #tpu.memory_space<smem>>
    return
  }
}

</mosaic_0001>

<bundles_post_ra>
// kernel: tpu_custom_call.1
= control target key start
LH: loop header
LB: loop body
LE: loop exit
PB: predicated region body
PF: predicated region fallthrough
CT: control target
= control target key end

     0   :  { %9 = vsyncpa [#allocation4], 0  ;;  %s898_s0 = inlined_call_operand.hbm [shape: f32[4], index: 0, kind: input, shape index: {}]   ;;  %s899_s1 = inlined_call_operand.hbm [shape: f32[24,32], index: 1, kind: input, shape index: {}]   ;;  %s900_s2 = inlined_call_operand.hbm [shape: f32[16,16], index: 2, kind: input, shape index: {}]   ;;  %s901_s3 = inlined_call_operand.hbm [shape: f32[16,256], index: 3, kind: input, shape index: {}]   ;;  %s902_s4 = inlined_call_operand.hbm [shape: f32[11], index: 4, kind: output, shape index: {}]  }
   0x1   :  { %10 = vsyncpa [#allocation3], 0 }
   0x2   :  { %11 = vsyncpa [#allocation8], 0 }
   0x3   :  { %12 = vsyncpa [#allocation5], 0  ;;  %s737_s15 = smov [#allocation7]   ;;  %s738_s17 = smov [#allocation6]  }
   0x4   :  { %s38_s16 = sshll.u32 %s737_s15, 4  ;;  %s26_s18 = sshll.u32 %s738_s17, 4  ;;  %s39_s16 = int_to_ptr.vmem [resolvable:$true] %s38_s16  ;;  %s27_s18 = int_to_ptr.vmem [resolvable:$true] %s26_s18 }
   0x5   :  { %s643_s21 = scalar_lea.hbm %s900_s2, 256 }
   0x6   :  { %p644_p0 = scmp.ne.s32.totalorder %s900_s2, %s643_s21  ;;  %p647_p1 = scmp.lt.u32.totalorder %s643_s21, %s900_s2 }
   0x8   :  { %p649_p2 = pnand %p647_p1, %p644_p0 }
   0xa   :  { %652 = shalt.err (!%p649_p2)
}
   0xb   :  { %s653_s26 = scalar_lea.vmem %s39_s16, 256  ;;  %p658_p4 = scmp.lt.s32.totalorder %s39_s16, %s39_s16 }
   0xc   :  { %p654_p3 = scmp.ne.s32.totalorder %s39_s16, %s653_s26  ;;  %p659_p5 = scmp.lt.s32.totalorder %s653_s26, %s653_s26 }
   0xe   :  { %p660_p6 = por %p659_p5, %p658_p4 }
  0x10   :  { %p661_p7 = pnand %p660_p6, %p654_p3 }
  0x12   :  { %664 = shalt.err (!%p661_p7)
}
  0x13   :  { %s739_s27 = smov 128   ;;  %s740_s28 = smov 8  }
  0x14   :  { %44 = dma.hbm_to_vmem [thread:$0]  %s900_s2, 256, %s39_s16, [#allocation8], %s739_s27, %s739_s27, %s740_s28  }
  0x15   :  { %s665_s7 = scalar_lea.hbm %s898_s0, 16 }
  0x16   :  { %p666_p8 = scmp.ne.s32.totalorder %s898_s0, %s665_s7  ;;  %p669_p9 = scmp.lt.u32.totalorder %s665_s7, %s898_s0 }
  0x18   :  { %p671_p10 = pnand %p669_p9, %p666_p8 }
  0x1a   :  { %674 = shalt.err (!%p671_p10)
}
  0x1b   :  { %s741_s12 = smov [#allocation2]   ;;  %s675_s16 = scalar_lea.hbm %s899_s1, 384 }
  0x1c   :  { %20 = dma.hbm_to_smem %s898_s0, 16, %s741_s12, [#allocation4]  }
  0x1d   :  { %p676_p11 = scmp.ne.s32.totalorder %s899_s1, %s675_s16  ;;  %p679_p12 = scmp.lt.u32.totalorder %s675_s16, %s899_s1 }
  0x1f   :  { %p681_p13 = pnand %p679_p12, %p676_p11 }
  0x21   :  { %684 = shalt.err (!%p681_p13)
}
  0x22   :  { %s685_s22 = scalar_lea.vmem %s27_s18, 384  ;;  %p690_p1 = scmp.lt.s32.totalorder %s27_s18, %s27_s18 }
  0x23   :  { %p686_p0 = scmp.ne.s32.totalorder %s27_s18, %s685_s22  ;;  %p691_p2 = scmp.lt.s32.totalorder %s685_s22, %s685_s22 }
  0x25   :  { %p692_p3 = por %p691_p2, %p690_p1 }
  0x27   :  { %p693_p4 = pnand %p692_p3, %p686_p0 }
  0x29   :  { %696 = shalt.err (!%p693_p4)
}
  0x2a   :  { %32 = dma.hbm_to_vmem [thread:$0]  %s899_s1, 384, %s27_s18, [#allocation3], %s739_s27, %s739_s27, %s740_s28  }
  0x2b   :  { %s742_s24 = smov [#allocation9]   ;;  %s697_s30 = scalar_lea.hbm %s901_s3, 512 }
  0x2c   :  { %s50_s25 = sshll.u32 %s742_s24, 4  ;;  %p698_p5 = scmp.ne.s32.totalorder %s901_s3, %s697_s30  ;;  %s51_s25 = int_to_ptr.vmem [resolvable:$true] %s50_s25 }
  0x2d   :  { %p701_p6 = scmp.lt.u32.totalorder %s697_s30, %s901_s3 }
  0x2f   :  { %p703_p7 = pnand %p701_p6, %p698_p5 }
  0x31   :  { %706 = shalt.err (!%p703_p7)
}
  0x32   :  { %s707_s9 = scalar_lea.vmem %s51_s25, 512  ;;  %p712_p9 = scmp.lt.s32.totalorder %s51_s25, %s51_s25 }
  0x33   :  { %p708_p8 = scmp.ne.s32.totalorder %s51_s25, %s707_s9  ;;  %p713_p10 = scmp.lt.s32.totalorder %s707_s9, %s707_s9 }
  0x35   :  { %p714_p11 = por %p713_p10, %p712_p9 }
  0x37   :  { %p715_p12 = pnand %p714_p11, %p708_p8 }
  0x39   :  { %718 = shalt.err (!%p715_p12)
}
  0x3a   :  { %s743_s1 = smov 256   ;;  %s744_s18 = smov 16  }
  0x3b   :  { %56 = dma.hbm_to_vmem [thread:$0]  %s901_s3, 512, %s51_s25, [#allocation8], %s743_s1, %s743_s1, %s744_s18  }
  0x3c   :  { %729 = dma.done.wait [#allocation4], 16  }
  0x3d   :  { %730 = vsyncadd [#allocation4], 4294967280 }
  0x3e   :  { %731 = dma.done.wait [#allocation3], 384  }
  0x3f   :  { %732 = vsyncadd [#allocation3], 4294966912 }
  0x40   :  { %733 = dma.done.wait [#allocation8], 768  }
  0x41   :  { %734 = vsyncadd [#allocation8], 4294966528 }
  0x42   :  { %69 = sfence }
  0x43   :  { %v75_v0 = vld [vmem:[#allocation6 + $0x8] sm:$0xff]  ;;  %vm80_vm0 = vcmask 261120   ;;  %v74_v1 = vld [vmem:[#allocation6] sm:$0xff]  ;;  %v76_v2 = vld [vmem:[#allocation6 + $0x10] sm:$0xff]  ;;  %v745_v9 = vmov 0.0|0.0   ;;  %vm746_vm1 = vmmov 0  }
  0x44   :  { %v78_v3 = vmul.f32 %v75_v0, %v75_v0  ;;  %v77_v4 = vmul.f32 %v74_v1, %v74_v1  ;;  %v79_v5 = vmul.f32 %v76_v2, %v76_v2  ;;  %566 = vmatprep.subr.bf16.mxu0 %v745_v9  ;;  %v747_v10 = vmov 0.0   ;;  %vm568_vm2 = vmpackc.low %vm80_vm0, %vm80_vm0  ;;  %s70_s3 = sld [smem:[#allocation2]]  ;;  %s748_s0 = smov 120  }
  0x45   :  { %563 = vmatprep.mubr.msk.f32.mxu0 %vm746_vm1, %v747_v10  ;;  %vm190_vm3 = vcmask 64512   ;;  %vm220_vm5 = vcmask 7168   ;;  %vm243_vm6 = vcmask 57344   ;;  %vm271_vm7 = vcmask 130112   ;;  %s877_s25 = sld [smem:[#allocation2 + $0x1]]  ;;  %s879_s26 = sld [smem:[#allocation2 + $0x2]] }
  0x46   :  { %v84_v6 = vsel %vm80_vm0, %v78_v3, 0.0  ;;  %v81_v7 = vsel %vm80_vm0, %v77_v4, 0.0  ;;  %v87_v8 = vsel %vm80_vm0, %v79_v5, 0.0  ;;  %vm381_vm10 = vcmask 130048   ;;  %s881_s30 = sld [smem:[#allocation2 + $0x3]] }
  0x47   :  { %85 = vadd.xlane.f32.xlu0 %v84_v6  ;;  %82 = vadd.xlane.f32.xlu1 %v81_v7 }
  0x4a   :  { %v830_v26 = vstv %s70_s3 }
  0x4b   :  { %88 = vadd.xlane.f32.xlu0 %v87_v8 }
  0xd4   :  { %v86_v11 = vpop.xlane.xlu0 %85  ;;  %v83_v12 = vpop.xlane.xlu1 %82 }
  0xd5   :  { %v91_v13 = vmax.f32 %v86_v11, 1e-24  ;;  %v90_v14 = vmax.f32 %v83_v12, 1e-24 }
  0xd7   :  { %617 = vrsqrt.f32 %v91_v13 }
  0xd8   :  { %619 = vrsqrt.f32 %v90_v14  ;;  %v89_v15 = vpop.xlane.xlu0 %88 }
  0xd9   :  { %v92_v16 = vmax.f32 %v89_v15, 1e-24 }
  0xdb   :  { %621 = vrsqrt.f32 %v92_v16 }
  0xe1   :  { %v618_v17 = vpop.eup %617 }
  0xe2   :  { %v620_v18 = vpop.eup %619  ;;  %v97_v19 = vmul.f32 %v618_v17, %v75_v0 }
  0xe3   :  { %v96_v20 = vmul.f32 %v620_v18, %v74_v1 }
  0xe5   :  { %v622_v21 = vpop.eup %621  ;;  %v99_v22 = vmul.f32 %v97_v19, %v96_v20 }
  0xe6   :  { %v98_v23 = vmul.f32 %v622_v21, %v76_v2 }
  0xe7   :  { %v100_v31 = vsel %vm80_vm0, %v99_v22, 0.0 }
  0xe8   :  { %v567_v24 = vpack.c.bf16 %v98_v23, %v97_v19  ;;  %v105_v25 = vmul.f32 %v98_v23, %v96_v20 }
  0xea   :  { %569 = vmatpush3.bf16.xpose.msk.msra.mxu0 %vm568_vm2, %v567_v24  ;;  %v106_v58 = vsel %vm80_vm0, %v105_v25, 0.0 }
  0xf1   :  { %564 = vmatmul.mubr.msk.f32.vlgmr.msra.gmra.mrb[0].mxu0 %vm80_vm0, %v96_v20 }
 0x1c4   :  { %v185_v27 = vpop.f32.mrb[0].mxu0 }
 0x1c5   :  { %v833_v28 = vmul.f32 %v185_v27, %v830_v26  ;;  %v565_v29 = vpop.f32.mrb[1].mxu0 }
 0x1c7   :  { %v191_v30 = vsel %vm190_vm3, %v833_v28, -inf  ;;  %v272_v57 = vsel %vm271_vm7, %v833_v28, -inf }
 0x1c8   :  { %192 = vmax.xlane.f32.xlu1 %v191_v30 }
 0x1cc   :  { %101 = vadd.xlane.f32.xlu1 %v100_v31 }
 0x255   :  { %v193_v32 = vpop.xlane.xlu1 %192 }
 0x256   :  { %v194_v33 = vrot.slane %v193_v32, 4 }
 0x258   :  { %v195_v34 = vmax.f32 %v193_v32, %v194_v33 }
 0x259   :  { %v102_v35 = vpop.xlane.xlu1 %101 }
 0x25a   :  { %v104_v36 = vmul.f32 %v830_v26, %v102_v35  ;;  %v196_v37 = vrot.slane %v195_v34, 2 }
 0x25c   :  { %v197_v38 = vmax.f32 %v195_v34, %v196_v37  ;;  %vm256_vm4 = vcmp.ge.f32.partialorder %v104_v36, %v193_v32  ;;  %v221_v48 = vsel %vm220_vm5, %v104_v36, 0.0 }
 0x25d   :  { %v550_v7 = vsel %vm256_vm4, 1.0, %v747_v10 }
 0x25e   :  { %v198_v39 = vrot.slane %v197_v38, 1  ;;  %v259_v8 = vsel %vm220_vm5, %v550_v7, 0.0 }
 0x260   :  { %v199_v40 = vmax.f32 %v197_v38, %v198_v39 }
 0x262   :  { %570 = vpush %v199_v40 }
 0x293   :  { %s571_s10 = spop %570 }
 0x294   :  { %v201_v41 = vstv %s571_s10 }
 0x295   :  { %v202_v42 = vsub.f32 %v833_v28, %v201_v41 }
 0x297   :  { %v203_v43 = vmul.f32 1.442695, %v202_v42 }
 0x299   :  { %623 = vpow2.f32 %v203_v43 }
 0x2a3   :  { %v624_v44 = vpop.eup %623 }
 0x2a4   :  { %v205_v45 = vsel %vm190_vm3, %v624_v44, 0.0 }
 0x2a5   :  { %206 = vadd.xlane.f32.xlu0 %v205_v45  ;;  %v211_v46 = vrot.slane %v205_v45, 4 }
 0x2a7   :  { %v212_v47 = vadd.f32 %v211_v46, %v205_v45 }
 0x2a9   :  { %v213_v49 = vrot.slane %v212_v47, 2  ;;  %222 = vadd.xlane.f32.xlu0 %v221_v48 }
 0x2ab   :  { %v214_v50 = vadd.f32 %v213_v49, %v212_v47  ;;  %v364_v49 = vld [vmem:[#allocation7] sm:$0xff] }
 0x2ac   :  { %vm409_vm11 = vcmp.ge.f32.partialorder %v364_v49, 0.0 }
 0x2ad   :  { %v215_v51 = vrot.slane %v214_v50, 1 }
 0x2af   :  { %v216_v52 = vadd.f32 %v215_v51, %v214_v50  ;;  %v369_v51 = vand.u32 2147483647, %v364_v49 }
 0x2b1   :  { %625 = vlog2.f32 %v216_v52  ;;  %v370_v52 = vsub.f32 0.0, %v369_v51 }
 0x2bb   :  { %v626_v53 = vpop.eup %625 }
 0x2bc   :  { %v218_v54 = vmul.f32 0.6931472, %v626_v53 }
 0x2be   :  { %v219_v55 = vadd.f32 %v218_v54, %v201_v41  ;;  %v371_v54 = vmul.f32 1.442695, %v370_v52 }
 0x2c0   :  { %v244_v56 = vsel %vm243_vm6, %v219_v55, 0.0 }
 0x2c1   :  { %245 = vadd.xlane.f32.xlu0 %v244_v56 }
 0x2c5   :  { %273 = vmax.xlane.f32.xlu0 %v272_v57 }
 0x2c9   :  { %107 = vadd.xlane.f32.xlu0 %v106_v58 }
 0x332   :  { %v207_v59 = vpop.xlane.xlu0 %206 }
 0x333   :  { %627 = vlog2.f32 %v207_v59 }
 0x336   :  { %v223_v60 = vpop.xlane.xlu0 %222 }
 0x337   :  { %v224_v61 = vrot.slane %v223_v60, 4 }
 0x339   :  { %v225_v62 = vadd.f32 %v224_v61, %v223_v60 }
 0x33b   :  { %v226_v63 = vrot.slane %v225_v62, 2 }
 0x33d   :  { %v628_v0 = vpop.eup %627  ;;  %v227_v1 = vadd.f32 %v226_v63, %v225_v62  ;;  %v365_v62 = vld [vmem:[#allocation7 + $0x8] sm:$0xff]  ;;  %v366_v63 = vmax.f32 %v364_v49, 0.0 }
 0x33e   :  { %v209_v2 = vmul.f32 0.6931472, %v628_v0  ;;  %v367_v0 = vmul.f32 %v365_v62, %v364_v49 }
 0x33f   :  { %v228_v3 = vrot.slane %v227_v1, 1 }
 0x340   :  { %v210_v4 = vadd.f32 %v209_v2, %v201_v41  ;;  %v377_v2 = vlaneseq }
 0x341   :  { %v229_v5 = vadd.f32 %v228_v3, %v227_v1  ;;  %v368_v3 = vsub.f32 %v366_v63, %v367_v0 }
 0x342   :  { %v231_v6 = vsel %vm220_vm5, %v210_v4, 0.0 }
 0x343   :  { %232 = vadd.xlane.f32.xlu1 %v231_v6  ;;  %572 = vpush %v229_v5  ;;  %v378_v5 = vand.u32 127, %v377_v2 }
 0x345   :  { %vm379_vm9 = vcmp.lt.s32.totalorder %v378_v5, 8 }
 0x347   :  { %260 = vadd.xlane.f32.xlu1 %v259_v8 }
 0x34e   :  { %v246_v9 = vpop.xlane.xlu0 %245 }
 0x34f   :  { %v247_v11 = vrot.slane %v246_v9, 4 }
 0x351   :  { %v248_v13 = vadd.f32 %v247_v11, %v246_v9 }
 0x352   :  { %v274_v12 = vpop.xlane.xlu0 %273 }
 0x353   :  { %v275_v14 = vrot.slane %v274_v12, 4  ;;  %v249_v15 = vrot.slane %v248_v13, 2 }
 0x355   :  { %v276_v16 = vmax.f32 %v274_v12, %v275_v14  ;;  %v250_v21 = vadd.f32 %v249_v15, %v248_v13  ;;  %v552_v13 = vsel %vm409_vm11, 1.0, %v747_v10 }
 0x356   :  { %v108_v44 = vpop.xlane.xlu0 %107  ;;  %vm412_vm12 = vcmp.eq.f32.partialorder %v552_v13, %v365_v62 }
 0x357   :  { %v277_v22 = vrot.slane %v276_v16, 2  ;;  %v251_v29 = vrot.slane %v250_v21, 1  ;;  %v109_v45 = vmul.f32 %v108_v44, %v830_v26  ;;  %v553_v14 = vsel %vm412_vm12, 1.0, %v747_v10 }
 0x358   :  { %v415_v15 = vsel %vm381_vm10, %v553_v14, 0.0 }
 0x359   :  { %v278_v30 = vmax.f32 %v276_v16, %v277_v22  ;;  %v252_v35 = vadd.f32 %v251_v29, %v250_v21  ;;  %vm344_vm8 = vcmp.ge.f32.partialorder %v109_v45, %v274_v12  ;;  %v306_v46 = vsel %vm220_vm5, %v109_v45, 0.0 }
 0x35a   :  { %v551_v47 = vsel %vm344_vm8, 1.0, %v747_v10 }
 0x35b   :  { %v279_v36 = vrot.slane %v278_v30, 1  ;;  %v347_v48 = vsel %vm220_vm5, %v551_v47, 0.0 }
 0x35d   :  { %v280_v39 = vmax.f32 %v278_v30, %v279_v36 }
 0x374   :  { %s573_s11 = spop %572 }
 0x3d0   :  { %v233_v17 = vpop.xlane.xlu1 %232 }
 0x3d1   :  { %v234_v18 = vrot.slane %v233_v17, 4 }
 0x3d3   :  { %v235_v19 = vadd.f32 %v234_v18, %v233_v17 }
 0x3d4   :  { %v261_v20 = vpop.xlane.xlu1 %260 }
 0x3d5   :  { %v236_v23 = vrot.slane %v235_v19, 2  ;;  %v262_v24 = vrot.slane %v261_v20, 4 }
 0x3d7   :  { %v263_v25 = vadd.f32 %v262_v24, %v261_v20  ;;  %v237_v27 = vadd.f32 %v236_v23, %v235_v19  ;;  %v430_v24 = vld [vmem:[#allocation9 + $0x10] sm:$0xff] }
 0x3d9   :  { %v264_v31 = vrot.slane %v263_v25, 2  ;;  %v238_v32 = vrot.slane %v237_v27, 1 }
 0x3db   :  { %v239_v33 = vadd.f32 %v238_v32, %v237_v27  ;;  %v265_v34 = vadd.f32 %v264_v31, %v263_v25  ;;  %v431_v25 = vld [vmem:[#allocation9 + $0x18] sm:$0xff]  ;;  %v432_v27 = vmax.f32 %v430_v24, -30.0 }
 0x3dc   :  { %v433_v29 = vmax.f32 %v431_v25, -30.0 }
 0x3dd   :  { %574 = vpush %v239_v33  ;;  %v266_v37 = vrot.slane %v265_v34, 1  ;;  %v434_v30 = vmin.f32 %v432_v27, 20.0 }
 0x3de   :  { %576 = vpush %v252_v35  ;;  %v435_v31 = vmin.f32 %v433_v29, 20.0 }
 0x3df   :  { %v267_v38 = vadd.f32 %v266_v37, %v265_v34  ;;  %v436_v32 = vmul.f32 0.5, %v434_v30  ;;  %v428_v37 = vld [vmem:[#allocation9] sm:$0xff] }
 0x3e0   :  { %v437_v33 = vmul.f32 0.5, %v435_v31 }
 0x3e1   :  { %578 = vpush %v267_v38  ;;  %v438_v10 = vmul.f32 1.442695, %v436_v32  ;;  %v429_v38 = vld [vmem:[#allocation9 + $0x8] sm:$0xff] }
 0x3e2   :  { %580 = vpush %v280_v39  ;;  %v440_v34 = vmul.f32 1.442695, %v437_v33  ;;  %v445_v44 = vmul.f32 %v429_v38, %v429_v38 }
 0x40e   :  { %s575_s12 = spop %574 }
 0x40f   :  { %s241_s13 = ssub.f32 %s575_s12, %s573_s11  ;;  %s577_s14 = spop %576 }
 0x410   :  { %s254_s2 = ssub.f32 %s577_s14, %s573_s11 }
 0x411   :  { %s850_s15 = smul.f32 0.125, %s241_s13 }
 0x412   :  { %s852_s16 = smul.f32 0.125, %s254_s2  ;;  %s579_s17 = spop %578 }
 0x413   :  { %s269_s19 = smul.f32 100.0, %s579_s17  ;;  %s581_s20 = spop %580 }
 0x414   :  { %s359_s21 = sadd.f32 %s852_s16, %s850_s15  ;;  %v856_v40 = vstv %s581_s20 }
 0x415   :  { %s270_s22 = smul.f32 0.125, %s269_s19  ;;  %v283_v41 = vsub.f32 %v833_v28, %v856_v40 }
 0x416   :  { %s360_s23 = smul.f32 0.5, %s359_s21 }
 0x417   :  { %509 = sst [smem:[#allocation10 + $0x1]] %s270_s22  ;;  %v284_v42 = vmul.f32 1.442695, %v283_v41 }
 0x419   :  { %629 = vpow2.f32 %v284_v42 }
 0x41a   :  { %631 = vpow2.f32 %v371_v54 }
 0x423   :  { %v630_v43 = vpop.eup %629 }
 0x424   :  { %287 = vrot.lane.b32.xlu1 %v630_v43, %s748_s0  ;;  %v296_v28 = vsel %vm271_vm7, %v630_v43, 0.0  ;;  %v632_v56 = vpop.eup %631  ;;  %v444_v43 = vmul.f32 %v428_v37, %v428_v37 }
 0x425   :  { %v297_v50 = vrot.slane %v296_v28, 4  ;;  %v373_v58 = vadd.f32 1.0, %v632_v56 }
 0x427   :  { %v298_v53 = vadd.f32 %v297_v50, %v296_v28  ;;  %633 = vlog2.f32 %v373_v58  ;;  %v464_v50 = vadd.f32 %v429_v38, %v428_v37 }
 0x429   :  { %v299_v55 = vrot.slane %v298_v53, 2 }
 0x42b   :  { %v300_v26 = vadd.f32 %v299_v55, %v298_v53 }
 0x42d   :  { %v301_v57 = vrot.slane %v300_v26, 1 }
 0x42f   :  { %v302_v60 = vadd.f32 %v301_v57, %v300_v26 }
 0x431   :  { %635 = vlog2.f32 %v302_v60  ;;  %v634_v1 = vpop.eup %633 }
 0x432   :  { %v375_v4 = vmul.f32 0.6931472, %v634_v1  ;;  %637 = vpow2.f32 %v438_v10 }
 0x433   :  { %639 = vpow2.f32 %v440_v34 }
 0x434   :  { %v376_v6 = vadd.f32 %v375_v4, %v368_v3 }
 0x436   :  { %v380_v8 = vsel %vm379_vm9, %v376_v6, 0.0  ;;  %v392_v16 = vsel %vm381_vm10, %v376_v6, 0.0 }
 0x437   :  { %v382_v9 = vsel %vm381_vm10, %v380_v8, 0.0 }
 0x43b   :  { %v636_v7 = vpop.eup %635 }
 0x43c   :  { %v304_v11 = vmul.f32 0.6931472, %v636_v7  ;;  %v638_v35 = vpop.eup %637 }
 0x43d   :  { %v640_v36 = vpop.eup %639  ;;  %v442_v41 = vmul.f32 %v638_v35, %v638_v35 }
 0x43e   :  { %v305_v12 = vadd.f32 %v304_v11, %v856_v40  ;;  %v443_v42 = vmul.f32 %v640_v36, %v640_v36  ;;  %v490_v26 = vmax.f32 %v638_v35, %v640_v36  ;;  %v477_v58 = vadd.f32 %v640_v36, %v638_v35 }
 0x43f   :  { %v446_v47 = vadd.f32 %v444_v43, %v442_v41 }
 0x441   :  { %v554_v28 = vadd.f32 -1.0, %v446_v47 }
 0x443   :  { %v450_v53 = vsub.f32 %v554_v28, %v434_v30 }
 0x448   :  { %307 = vadd.xlane.f32.xlu1 %v306_v46 }
 0x44c   :  { %348 = vadd.xlane.f32.xlu1 %v347_v48  ;;  %v447_v48 = vadd.f32 %v445_v44, %v443_v42 }
 0x44e   :  { %v555_v49 = vadd.f32 -1.0, %v447_v48 }
 0x450   :  { %383 = vadd.xlane.f32.xlu1 %v382_v9  ;;  %v451_v54 = vsub.f32 %v555_v49, %v435_v31 }
 0x452   :  { %v452_v57 = vadd.f32 %v451_v54, %v450_v53 }
 0x496   :  { %v288_v59 = vpop.permute.xlu1 %287 }
 0x497   :  { %v290_v61 = vsel %vm190_vm3, %v288_v59, 0.0 }
 0x498   :  { %291 = vadd.xlane.f32.xlu0 %v290_v61 }
 0x4ae   :  { %329 = vrot.lane.b32.xlu0 %v305_v12, %s748_s0 }
 0x4cd   :  { %393 = vadd.xlane.f32.xlu0 %v392_v16 }
 0x4d5   :  { %v308_v17 = vpop.xlane.xlu1 %307 }
 0x4d6   :  { %v309_v18 = vrot.slane %v308_v17, 4 }
 0x4d8   :  { %v310_v19 = vadd.f32 %v309_v18, %v308_v17 }
 0x4d9   :  { %v349_v59 = vpop.xlane.xlu1 %348 }
 0x4da   :  { %v311_v20 = vrot.slane %v310_v19, 2  ;;  %v350_v0 = vrot.slane %v349_v59, 4 }
 0x4dc   :  { %v312_v21 = vadd.f32 %v311_v20, %v310_v19  ;;  %v351_v5 = vadd.f32 %v350_v0, %v349_v59 }
 0x4dd   :  { %v384_v60 = vpop.xlane.xlu1 %383 }
 0x4de   :  { %v313_v22 = vrot.slane %v312_v21, 1  ;;  %v385_v2 = vrot.slane %v384_v60, 4 }
 0x4e0   :  { %v314_v23 = vadd.f32 %v313_v22, %v312_v21  ;;  %v386_v7 = vadd.f32 %v385_v2, %v384_v60 }
 0x4e2   :  { %582 = vpush %v314_v23  ;;  %v387_v18 = vrot.slane %v386_v7, 2 }
 0x4e4   :  { %v388_v33 = vadd.f32 %v387_v18, %v386_v7 }
 0x513   :  { %s583_s24 = spop %582 }
 0x525   :  { %v292_v39 = vpop.xlane.xlu0 %291 }
 0x526   :  { %641 = vlog2.f32 %v292_v39 }
 0x529   :  { %v330_v45 = vpop.permute.xlu0 %329 }
 0x52a   :  { %v332_v46 = vsel %vm243_vm6, %v330_v45, 0.0 }
 0x52b   :  { %333 = vadd.xlane.f32.xlu1 %v332_v46  ;;  %v389_v46 = vrot.slane %v388_v33, 1 }
 0x52f   :  { %416 = vadd.xlane.f32.xlu1 %v415_v15  ;;  %v352_v15 = vrot.slane %v351_v5, 2 }
 0x530   :  { %v642_v51 = vpop.eup %641 }
 0x531   :  { %v294_v52 = vmul.f32 0.6931472, %v642_v51  ;;  %v353_v31 = vadd.f32 %v352_v15, %v351_v5 }
 0x533   :  { %v295_v55 = vadd.f32 %v294_v52, %v856_v40  ;;  %465 = vadd.xlane.f32.xlu1 %v464_v50  ;;  %v354_v44 = vrot.slane %v353_v31, 1 }
 0x535   :  { %v316_v56 = vsel %vm220_vm5, %v295_v55, 0.0  ;;  %v355_v54 = vadd.f32 %v354_v44, %v353_v31 }
 0x536   :  { %317 = vadd.xlane.f32.xlu0 %v316_v56 }
 0x537   :  { %491 = vmax.xlane.f32.xlu1 %v490_v26  ;;  %v390_v26 = vadd.f32 %v389_v46, %v388_v33 }
 0x53a   :  { %453 = vadd.xlane.f32.xlu0 %v452_v57 }
 0x53e   :  { %478 = vadd.xlane.f32.xlu0 %v477_v58 }
 0x55a   :  { %v394_v63 = vpop.xlane.xlu0 %393 }
 0x55b   :  { %v395_v3 = vrot.slane %v394_v63, 4 }
 0x55d   :  { %v396_v9 = vadd.f32 %v395_v3, %v394_v63 }
 0x55f   :  { %v397_v20 = vrot.slane %v396_v9, 2 }
 0x561   :  { %v398_v35 = vadd.f32 %v397_v20, %v396_v9 }
 0x563   :  { %v399_v28 = vrot.slane %v398_v35, 1 }
 0x565   :  { %v400_v58 = vadd.f32 %v399_v28, %v398_v35 }
 0x5b8   :  { %v334_v61 = vpop.xlane.xlu1 %333 }
 0x5b9   :  { %v335_v62 = vrot.slane %v334_v61, 4 }
 0x5bb   :  { %v336_v40 = vadd.f32 %v335_v62, %v334_v61 }
 0x5bc   :  { %v417_v1 = vpop.xlane.xlu1 %416 }
 0x5bd   :  { %v418_v4 = vrot.slane %v417_v1, 4  ;;  %v337_v11 = vrot.slane %v336_v40, 2 }
 0x5bf   :  { %v419_v12 = vadd.f32 %v418_v4, %v417_v1  ;;  %v338_v27 = vadd.f32 %v337_v11, %v336_v40 }
 0x5c0   :  { %v466_v6 = vpop.xlane.xlu1 %465 }
 0x5c1   :  { %v467_v8 = vrot.slane %v466_v6, 4  ;;  %v420_v22 = vrot.slane %v419_v12, 2  ;;  %v339_v37 = vrot.slane %v338_v27, 1 }
 0x5c3   :  { %v318_v13 = vpop.xlane.xlu0 %317  ;;  %v468_v14 = vadd.f32 %v467_v8, %v466_v6  ;;  %v421_v38 = vadd.f32 %v420_v22, %v419_v12  ;;  %v340_v50 = vadd.f32 %v339_v37, %v338_v27 }
 0x5c4   :  { %v319_v16 = vrot.slane %v318_v13, 4  ;;  %v492_v17 = vpop.xlane.xlu1 %491 }
 0x5c5   :  { %v493_v19 = vrot.slane %v492_v17, 4  ;;  %v469_v23 = vrot.slane %v468_v14, 2  ;;  %v422_v51 = vrot.slane %v421_v38, 1 }
 0x5c6   :  { %v320_v21 = vadd.f32 %v319_v16, %v318_v13 }
 0x5c7   :  { %v454_v24 = vpop.xlane.xlu0 %453  ;;  %v494_v25 = vmax.f32 %v492_v17, %v493_v19  ;;  %v470_v39 = vadd.f32 %v469_v23, %v468_v14  ;;  %v423_v60 = vadd.f32 %v422_v51, %v421_v38 }
 0x5c8   :  { %v321_v29 = vrot.slane %v320_v21, 2  ;;  %v455_v30 = vrot.slane %v454_v24, 4 }
 0x5c9   :  { %v495_v32 = vrot.slane %v494_v25, 2  ;;  %v471_v52 = vrot.slane %v470_v39, 1 }
 0x5ca   :  { %v456_v10 = vadd.f32 %v455_v30, %v454_v24  ;;  %v322_v34 = vadd.f32 %v321_v29, %v320_v21 }
 0x5cb   :  { %v479_v36 = vpop.xlane.xlu0 %478  ;;  %v496_v45 = vmax.f32 %v494_v25, %v495_v32  ;;  %v472_v61 = vadd.f32 %v471_v52, %v470_v39 }
 0x5cc   :  { %v457_v41 = vrot.slane %v456_v10, 2  ;;  %v480_v42 = vrot.slane %v479_v36, 4  ;;  %v323_v43 = vrot.slane %v322_v34, 1 }
 0x5cd   :  { %v497_v56 = vrot.slane %v496_v45, 1 }
 0x5ce   :  { %v481_v47 = vadd.f32 %v480_v42, %v479_v36  ;;  %v324_v48 = vadd.f32 %v323_v43, %v322_v34  ;;  %v458_v49 = vadd.f32 %v457_v41, %v456_v10 }
 0x5cf   :  { %v498_v63 = vmax.f32 %v496_v45, %v497_v56 }
 0x5d0   :  { %v482_v53 = vrot.slane %v481_v47, 2  ;;  %584 = vpush %v324_v48  ;;  %v459_v55 = vrot.slane %v458_v49, 1 }
 0x5d1   :  { %586 = vpush %v340_v50 }
 0x5d2   :  { %v483_v57 = vadd.f32 %v482_v53, %v481_v47  ;;  %588 = vpush %v355_v54  ;;  %v460_v59 = vadd.f32 %v459_v55, %v458_v49 }
 0x5d3   :  { %590 = vpush %v390_v26 }
 0x5d4   :  { %592 = vpush %v400_v58  ;;  %v484_v62 = vrot.slane %v483_v57, 1 }
 0x5d5   :  { %594 = vpush %v423_v60 }
 0x5d6   :  { %596 = vpush %v460_v59  ;;  %v485_v0 = vadd.f32 %v484_v62, %v483_v57 }
 0x5d7   :  { %598 = vpush %v472_v61 }
 0x5d8   :  { %600 = vpush %v485_v0 }
 0x5d9   :  { %602 = vpush %v498_v63 }
 0x601   :  { %s585_s29 = spop %584 }
 0x602   :  { %s326_s5 = ssub.f32 %s585_s29, %s583_s24  ;;  %s587_s6 = spop %586 }
 0x603   :  { %s342_s7 = ssub.f32 %s587_s6, %s583_s24  ;;  %s589_s8 = spop %588 }
 0x604   :  { %s327_s9 = smul.f32 0.125, %s326_s5  ;;  %s591_s1 = spop %590 }
 0x605   :  { %s343_s18 = smul.f32 0.125, %s342_s7  ;;  %s593_s27 = spop %592 }
 0x606   :  { %s357_s28 = smul.f32 100.0, %s589_s8  ;;  %s405_s3 = ssub.f32 %s593_s27, %s591_s1 }
 0x607   :  { %s361_s10 = sadd.f32 %s343_s18, %s327_s9  ;;  %s404_s11 = smul.f32 0.015625, %s591_s1 }
 0x608   :  { %s358_s12 = smul.f32 0.125, %s357_s28  ;;  %s595_s13 = spop %594 }
 0x609   :  { %s362_s14 = smul.f32 0.5, %s361_s10  ;;  %513 = sst [smem:[#allocation10 + $0x3]] %s404_s11 }
 0x60a   :  { %511 = sst [smem:[#allocation10 + $0x2]] %s358_s12  ;;  %s408_s2 = smul.f32 0.015625, %s405_s3 }
 0x60b   :  { %s363_s15 = sadd.f32 %s362_s14, %s360_s23  ;;  %s427_s16 = smul.f32 0.0078125, %s595_s13 }
 0x60c   :  { %515 = sst [smem:[#allocation10 + $0x4]] %s408_s2  ;;  %s500_s17 = smul.f32 %s879_s26, %s408_s2 }
 0x60d   :  { %507 = sst [smem:[#allocation10]] %s363_s15  ;;  %s597_s19 = spop %596 }
 0x60e   :  { %517 = sst [smem:[#allocation10 + $0x5]] %s427_s16  ;;  %s462_s20 = smul.f32 0.5, %s597_s19 }
 0x60f   :  { %s504_s21 = smul.f32 %s877_s25, %s363_s15  ;;  %s599_s22 = spop %598 }
 0x610   :  { %s463_s0 = smul.f32 0.125, %s462_s20  ;;  %s601_s24 = spop %600 }
 0x611   :  { %s501_s29 = sadd.f32 %s500_s17, %s404_s11  ;;  %s476_s5 = smul.f32 0.00048828125, %s599_s22 }
 0x612   :  { %s502_s6 = smul.f32 %s881_s30, %s463_s0  ;;  %519 = sst [smem:[#allocation10 + $0x6]] %s463_s0 }
 0x613   :  { %523 = sst [smem:[#allocation10 + $0x8]] %s476_s5  ;;  %s489_s7 = smul.f32 0.00048828125, %s601_s24 }
 0x614   :  { %s503_s8 = sadd.f32 %s502_s6, %s501_s29  ;;  %s603_s9 = spop %602 }
 0x615   :  { %525 = sst [smem:[#allocation10 + $0x9]] %s489_s7  ;;  %s719_s18 = scalar_lea.hbm %s902_s4, 16 }
 0x616   :  { %s505_s23 = sadd.f32 %s504_s21, %s503_s8  ;;  %p720_p13 = scmp.ne.s32.totalorder %s902_s4, %s719_s18 }
 0x617   :  { %527 = sst [smem:[#allocation10 + $0xa]] %s603_s9  ;;  %p723_p0 = scmp.lt.u32.totalorder %s719_s18, %s902_s4 }
 0x618   :  { %521 = sst [smem:[#allocation10 + $0x7]] %s505_s23 }
 0x619   :  { %p725_p1 = pnand %p723_p0, %p720_p13 }
 0x61b   :  { %728 = shalt.err (!%p725_p1)
}
 0x61c   :  { %s749_s30 = smov [#allocation10]  }
 0x61d   :  { %535 = dma.smem_to_hbm %s749_s30, 16, %s902_s4, [#allocation5]  }
 0x61e   :  { %735 = dma.done.wait [#allocation5], 16  }
 0x61f   :  { %736 = vsyncadd [#allocation5], 4294967280 }
 0x620   :  { %539 = sfence }
 0x621   :  { %540 = vsyncpa [#allocation3], 1 }
 0x622   :  { %541 = vsyncpa [#allocation8], 1 }
 0x623   :  { %542 = vsyncpa [#allocation4], 1 }
 0x624   :  { %543 = vsyncpa [#allocation5], 1 }

</bundles_post_ra>
